<compile_context>
chip_gen: v6e
topology: v6e:2x2x1
jax: 0.10.0
libtpu: 0.0.40
codegen_flags: <defaults>
</compile_context>

<pallas_src>
import functools

import jax
import jax.numpy as jnp
import numpy as np
from jax.experimental import pallas as pl
from jax.experimental.pallas import tpu as pltpu


def _cab_kernel(x1_ref, x2_ref, w1_ref, b1_ref, w2_ref, b2_ref, o_ref, *, inv_hw):
    # x1_ref / x2_ref / o_ref blocks: (BR, HW) with BR = BN*C rows (sublanes)
    # and HW on lanes.  w1_ref: (BR, 2*BR) block-diagonal fused conv1 weight,
    # w2_ref: (BR, BR) block-diagonal conv2 weight, b1/b2: (BR, 1) tiled bias.

    # Global average pool of cat([x1, x2], dim=1) == per-row means of each.
    # f32 accumulation; the reads are consumed by the reduction so no big
    # upcast copy stays live across the attention chain.
    m1 = jnp.sum(x1_ref[...], axis=-1, keepdims=True, dtype=jnp.float32) * inv_hw
    m2 = jnp.sum(x2_ref[...], axis=-1, keepdims=True, dtype=jnp.float32) * inv_hw
    m = jnp.concatenate([m1, m2], axis=0)                    # (2*BR, 1)

    # conv1 (1x1 + bias), both input halves fused into a single dot, then ReLU.
    h = jnp.dot(w1_ref[...], m, preferred_element_type=jnp.float32) + b1_ref[...]
    h = jnp.maximum(h, 0.0)

    # conv2 (1x1 + bias) + sigmoid -> per-(image, channel) attention column.
    a = jax.nn.sigmoid(
        jnp.dot(w2_ref[...], h, preferred_element_type=jnp.float32) + b2_ref[...])

    # out = a * x2 + x1, attention broadcast along the lane (spatial) axis.
    # Re-read the input refs here instead of keeping earlier copies alive.
    o_ref[...] = (a * x2_ref[...].astype(jnp.float32)
                  + x1_ref[...].astype(jnp.float32)).astype(o_ref.dtype)


def _pick_block_images(N, C, HW, itemsize):
    """Images per grid step.

    Goals / constraints:
      * whole images per block, BN divides N,
      * rows = BN*C a multiple of 8 (sublane-dense) or == N*C (full array),
        so the (8, 128) BlockSpec rule holds,
      * per-stream block <= ~1 MiB (and rows <= 256 so the block-diagonal
        conv weights stay tiny),
      * >= 2 grid steps when the batch allows it (pipelining + v7x's 2 TCs).
    """
    total_rows = N * C
    cap_rows = max(8, min(256, (1 << 20) // max(1, HW * itemsize)))
    cand = []
    for bn in range(1, N + 1):
        if N % bn:
            continue
        rows = bn * C
        if rows % 8 and rows != total_rows:
            continue
        if rows <= cap_rows:
            cand.append(bn)
    if not cand:
        return N
    min_steps = 4 if N * C * HW * itemsize >= (4 << 20) else 2
    multi = [bn for bn in cand if N // bn >= min_steps]
    return max(multi) if multi else max(cand)


def cab_pallas(x1, x2, w1, b1, w2, b2, *, block_images=None):
    """x1, x2: (N, C, H, W); w1: (C, 2C); b1: (C,); w2: (C, C); b2: (C,)."""
    N, C, H, W = x1.shape
    assert x2.shape == x1.shape
    assert w1.shape == (C, 2 * C) and w2.shape == (C, C)
    HW = H * W
    # TODO(synk): if H*W is ever not a multiple of 128, pad the lane axis
    # host-side to keep stores unmasked (HW=256 here is already lane-aligned).

    itemsize = jnp.dtype(x1.dtype).itemsize
    BN = (_pick_block_images(N, C, HW, itemsize)
          if block_images is None else block_images)
    assert N % BN == 0, "batch must be divisible by the batch tile"
    BR = BN * C                                           # rows per block
    assert BR % 8 == 0 or BR == N * C, "block rows must be 8-aligned or full"

    # Sublane-dense views: (N, C, H, W) -> (N*C, H*W); spatial on lanes.
    # Row r corresponds to (image, channel) = (r // C, r % C).
    x1f = x1.reshape(N * C, HW)
    x2f = x2.reshape(N * C, HW)

    # Host-side constant transforms.  conv1's input channels are split into
    # the x1-/x2- halves (the channel concat never materializes) and both
    # 1x1 convs are expanded to block-diagonal matrices over the BR rows of a
    # block, so the in-kernel attention path needs no reshape / transpose.
    w1a = w1[:, :C].astype(jnp.float32)                   # acts on pooled x1
    w1b = w1[:, C:].astype(jnp.float32)                   # acts on pooled x2
    eye = jnp.eye(BN, dtype=jnp.float32)
    big_w1 = jnp.concatenate(
        [jnp.kron(eye, w1a), jnp.kron(eye, w1b)], axis=1)          # (BR, 2*BR)
    big_w2 = jnp.kron(eye, w2.astype(jnp.float32))                 # (BR, BR)
    b1t = jnp.tile(b1.astype(jnp.float32), BN).reshape(BR, 1)      # (BR, 1)
    b2t = jnp.tile(b2.astype(jnp.float32), BN).reshape(BR, 1)      # (BR, 1)

    kernel = functools.partial(_cab_kernel, inv_hw=1.0 / float(HW))

    num_blocks = N // BN
    cost = pl.CostEstimate(
        flops=4 * N * C * HW + 6 * N * C * BR,            # pool + epilogue + dots
        transcendentals=N * C,                            # sigmoid
        bytes_accessed=3 * N * C * HW * itemsize + (3 * BR * BR + 2 * BR) * 4,
    )

    grid_spec = pltpu.PrefetchScalarGridSpec(
        num_scalar_prefetch=0,
        grid=(num_blocks,),
        in_specs=[
            pl.BlockSpec((BR, HW), lambda i: (i, 0)),         # x1 rows
            pl.BlockSpec((BR, HW), lambda i: (i, 0)),         # x2 rows
            pl.BlockSpec((BR, 2 * BR), lambda i: (0, 0)),     # fused conv1 weight
            pl.BlockSpec((BR, 1), lambda i: (0, 0)),          # conv1 bias (tiled)
            pl.BlockSpec((BR, BR), lambda i: (0, 0)),         # conv2 weight
            pl.BlockSpec((BR, 1), lambda i: (0, 0)),          # conv2 bias (tiled)
        ],
        out_specs=pl.BlockSpec((BR, HW), lambda i: (i, 0)),
    )

    out = pl.pallas_call(
        kernel,
        out_shape=jax.ShapeDtypeStruct((N * C, HW), x1.dtype),
        grid_spec=grid_spec,
        compiler_params=pltpu.CompilerParams(
            dimension_semantics=("parallel",)),
        cost_estimate=cost,
    )(x1f, x2f, big_w1, b1t, big_w2, b2t)

    return out.reshape(N, C, H, W)


def reference_forward(x1, x2, w1, b1, w2, b2):
    """Pure-JAX reference mirroring the PyTorch CAB forward (NCHW)."""
    x = jnp.concatenate([x1, x2], axis=1)                      # (N, 2C, H, W)
    g = jnp.mean(x, axis=(2, 3), keepdims=True)                # (N, 2C, 1, 1)
    h = jnp.einsum("ncij,oc->noij", g, w1) + b1[None, :, None, None]
    h = jnp.maximum(h, 0.0)
    h = jnp.einsum("ncij,oc->noij", h, w2) + b2[None, :, None, None]
    a = jax.nn.sigmoid(h)
    return a * x2 + x1


if __name__ == "__main__":
    # CAB(in_channels=2*C, out_channels=C): the residual add (a*x2 + x1)
    # forces x1/x2/out channel counts to all equal C.
    N, C, H, W = 2, 4, 16, 16

    key = jax.random.PRNGKey(0)
    k1, k2, kw1, kb1, kw2, kb2 = jax.random.split(key, 6)

    x1 = jax.random.normal(k1, (N, C, H, W), jnp.float32)
    x2 = jax.random.normal(k2, (N, C, H, W), jnp.float32)
    w1 = 0.2 * jax.random.normal(kw1, (C, 2 * C), jnp.float32)   # conv1 (out, in)
    b1 = 0.1 * jax.random.normal(kb1, (C,), jnp.float32)
    w2 = 0.2 * jax.random.normal(kw2, (C, C), jnp.float32)       # conv2 (out, in)
    b2 = 0.1 * jax.random.normal(kb2, (C,), jnp.float32)

    out = cab_pallas(x1, x2, w1, b1, w2, b2)
    out = jax.block_until_ready(out)

    ref = reference_forward(x1, x2, w1, b1, w2, b2)
    np.testing.assert_allclose(np.asarray(out), np.asarray(ref),
                               rtol=1e-4, atol=1e-4)

    print("KERNEL_OK")
</pallas_src>

<mosaic_0001>
module attributes {stable_mosaic.version = 11 : i64} {
  func.func @_cab_kernel(%arg0: i32, %arg1: memref<8x256xf32, #tpu.memory_space<vmem>>, %arg2: memref<8x256xf32, #tpu.memory_space<vmem>>, %arg3: memref<8x16xf32, #tpu.memory_space<vmem>>, %arg4: memref<8x1xf32, #tpu.memory_space<vmem>>, %arg5: memref<8x8xf32, #tpu.memory_space<vmem>>, %arg6: memref<8x1xf32, #tpu.memory_space<vmem>>, %arg7: memref<8x256xf32, #tpu.memory_space<vmem>>) attributes {dimension_semantics = [#tpu.dimension_semantics<parallel>], iteration_bounds = array<i64: 1>, scalar_prefetch = 0 : i64, scratch_operands = 0 : i64, tpu.core_type = #tpu.core_type<tc>, window_params = [{transform_indices = @transform_0, window_bounds = array<i64: 8, 256>}, {transform_indices = @transform_1, window_bounds = array<i64: 8, 256>}, {pipeline_mode = #tpu.pipeline_mode<synchronous>, transform_indices = @transform_2, window_bounds = array<i64: 8, 16>}, {pipeline_mode = #tpu.pipeline_mode<synchronous>, transform_indices = @transform_3, window_bounds = array<i64: 8, 1>}, {pipeline_mode = #tpu.pipeline_mode<synchronous>, transform_indices = @transform_4, window_bounds = array<i64: 8, 8>}, {pipeline_mode = #tpu.pipeline_mode<synchronous>, transform_indices = @transform_5, window_bounds = array<i64: 8, 1>}, {transform_indices = @transform_6, window_bounds = array<i64: 8, 256>}]} {
    %c0 = arith.constant 0 : index
    %c0_0 = arith.constant 0 : index
    %0 = vector.load %arg1[%c0, %c0_0] : memref<8x256xf32, #tpu.memory_space<vmem>>, vector<8x256xf32>
    %cst = arith.constant dense<0.000000e+00> : vector<8xf32>
    %1 = vector.multi_reduction <add>, %0, %cst [1] : vector<8x256xf32> to vector<8xf32>
    %2 = vector.shape_cast %1 : vector<8xf32> to vector<8x1xf32>
    %cst_1 = arith.constant 3.906250e-03 : f32
    %3 = vector.broadcast %cst_1 : f32 to vector<8x1xf32>
    %4 = arith.mulf %2, %3 : vector<8x1xf32>
    %c0_2 = arith.constant 0 : index
    %c0_3 = arith.constant 0 : index
    %5 = vector.load %arg2[%c0_2, %c0_3] : memref<8x256xf32, #tpu.memory_space<vmem>>, vector<8x256xf32>
    %cst_4 = arith.constant dense<0.000000e+00> : vector<8xf32>
    %6 = vector.multi_reduction <add>, %5, %cst_4 [1] : vector<8x256xf32> to vector<8xf32>
    %7 = vector.shape_cast %6 : vector<8xf32> to vector<8x1xf32>
    %cst_5 = arith.constant 3.906250e-03 : f32
    %8 = vector.broadcast %cst_5 : f32 to vector<8x1xf32>
    %9 = arith.mulf %7, %8 : vector<8x1xf32>
    %10 = tpu.concatenate %4, %9 in 0 : vector<8x1xf32>, vector<8x1xf32> -> vector<16x1xf32>
    %c0_6 = arith.constant 0 : index
    %c0_7 = arith.constant 0 : index
    %11 = vector.load %arg3[%c0_6, %c0_7] : memref<8x16xf32, #tpu.memory_space<vmem>>, vector<8x16xf32>
    %cst_8 = arith.constant dense<0.000000e+00> : vector<8x1xf32>
    %12 = tpu.matmul %11, %10, %cst_8 {dimension_numbers = #tpu.dot_dimension_numbers<[1], [0], [0], [1], [0, 0, 1, 1], [], []>} : vector<8x16xf32>, vector<16x1xf32>, vector<8x1xf32> -> vector<8x1xf32>
    %c0_9 = arith.constant 0 : index
    %c0_10 = arith.constant 0 : index
    %13 = vector.load %arg4[%c0_9, %c0_10] : memref<8x1xf32, #tpu.memory_space<vmem>>, vector<8x1xf32>
    %14 = arith.addf %12, %13 : vector<8x1xf32>
    %cst_11 = arith.constant 0.000000e+00 : f32
    %15 = vector.broadcast %cst_11 : f32 to vector<8x1xf32>
    %16 = arith.maximumf %14, %15 : vector<8x1xf32>
    %c0_12 = arith.constant 0 : index
    %c0_13 = arith.constant 0 : index
    %17 = vector.load %arg5[%c0_12, %c0_13] : memref<8x8xf32, #tpu.memory_space<vmem>>, vector<8x8xf32>
    %cst_14 = arith.constant dense<0.000000e+00> : vector<8x1xf32>
    %18 = tpu.matmul %17, %16, %cst_14 {dimension_numbers = #tpu.dot_dimension_numbers<[1], [0], [0], [1], [0, 0, 1, 1], [], []>} : vector<8x8xf32>, vector<8x1xf32>, vector<8x1xf32> -> vector<8x1xf32>
    %c0_15 = arith.constant 0 : index
    %c0_16 = arith.constant 0 : index
    %19 = vector.load %arg6[%c0_15, %c0_16] : memref<8x1xf32, #tpu.memory_space<vmem>>, vector<8x1xf32>
    %20 = arith.addf %18, %19 : vector<8x1xf32>
    %21 = arith.negf %20 : vector<8x1xf32>
    %22 = math.exp %21 : vector<8x1xf32>
    %cst_17 = arith.constant 1.000000e+00 : f32
    %23 = vector.broadcast %cst_17 : f32 to vector<8x1xf32>
    %24 = arith.addf %23, %22 : vector<8x1xf32>
    %25 = arith.divf %23, %24 : vector<8x1xf32>
    %c0_18 = arith.constant 0 : index
    %c0_19 = arith.constant 0 : index
    %26 = vector.load %arg2[%c0_18, %c0_19] : memref<8x256xf32, #tpu.memory_space<vmem>>, vector<8x256xf32>
    %27 = vector.broadcast %25 : vector<8x1xf32> to vector<8x256xf32>
    %28 = arith.mulf %27, %26 : vector<8x256xf32>
    %c0_20 = arith.constant 0 : index
    %c0_21 = arith.constant 0 : index
    %29 = vector.load %arg1[%c0_20, %c0_21] : memref<8x256xf32, #tpu.memory_space<vmem>>, vector<8x256xf32>
    %30 = arith.addf %28, %29 : vector<8x256xf32>
    %c0_22 = arith.constant 0 : index
    %c0_23 = arith.constant 0 : index
    %31 = vector.load %arg7[%c0_22, %c0_23] : memref<8x256xf32, #tpu.memory_space<vmem>>, vector<8x256xf32>
    tpu.vector_store %arg7[%c0_22, %c0_23], %30 {strides = array<i32>} : memref<8x256xf32, #tpu.memory_space<vmem>>, vector<8x256xf32>,
    return
  }
  func.func @transform_0(%arg0: i32) -> (i32, i32) {
    %c0_i32 = arith.constant 0 : i32
    %c0_i32_0 = arith.constant 0 : i32
    return %arg0, %c0_i32 : i32, i32
  }
  func.func @transform_1(%arg0: i32) -> (i32, i32) {
    %c0_i32 = arith.constant 0 : i32
    %c0_i32_0 = arith.constant 0 : i32
    return %arg0, %c0_i32 : i32, i32
  }
  func.func @transform_2(%arg0: i32) -> (i32, i32) {
    %c0_i32 = arith.constant 0 : i32
    %c0_i32_0 = arith.constant 0 : i32
    %c0_i32_1 = arith.constant 0 : i32
    return %c0_i32, %c0_i32_0 : i32, i32
  }
  func.func @transform_3(%arg0: i32) -> (i32, i32) {
    %c0_i32 = arith.constant 0 : i32
    %c0_i32_0 = arith.constant 0 : i32
    %c0_i32_1 = arith.constant 0 : i32
    return %c0_i32, %c0_i32_0 : i32, i32
  }
  func.func @transform_4(%arg0: i32) -> (i32, i32) {
    %c0_i32 = arith.constant 0 : i32
    %c0_i32_0 = arith.constant 0 : i32
    %c0_i32_1 = arith.constant 0 : i32
    return %c0_i32, %c0_i32_0 : i32, i32
  }
  func.func @transform_5(%arg0: i32) -> (i32, i32) {
    %c0_i32 = arith.constant 0 : i32
    %c0_i32_0 = arith.constant 0 : i32
    %c0_i32_1 = arith.constant 0 : i32
    return %c0_i32, %c0_i32_0 : i32, i32
  }
  func.func @transform_6(%arg0: i32) -> (i32, i32) {
    %c0_i32 = arith.constant 0 : i32
    %c0_i32_0 = arith.constant 0 : i32
    return %arg0, %c0_i32 : i32, i32
  }
}

</mosaic_0001>

<bundles_post_ra>
// kernel: tpu_custom_call.1
= control target key start
LH: loop header
LB: loop body
LE: loop exit
PB: predicated region body
PF: predicated region fallthrough
CT: control target
= control target key end

     0   :  { %11 = vsyncpa [#allocation3], 0  ;;  %s409_s0 = inlined_call_operand.vmem [shape: f32[8,256], index: 0, kind: input, shape index: {}]   ;;  %s410_s1 = inlined_call_operand.hbm [shape: f32[8,256], index: 1, kind: input, shape index: {}]   ;;  %s411_s2 = inlined_call_operand.hbm [shape: f32[8,16], index: 2, kind: input, shape index: {}]   ;;  %s412_s3 = inlined_call_operand.vmem [shape: f32[8,1], index: 3, kind: input, shape index: {}]   ;;  %s413_s4 = inlined_call_operand.vmem [shape: f32[8,8], index: 4, kind: input, shape index: {}]   ;;  %s414_s5 = inlined_call_operand.vmem [shape: f32[8,1], index: 5, kind: input, shape index: {}]   ;;  %s415_s6 = inlined_call_operand.hbm [shape: f32[8,256], index: 6, kind: output, shape index: {}]  }
   0x1   :  { %12 = vsyncpa [#allocation6], 0 }
   0x2   :  { %13 = vsyncpa [#allocation4], 0  ;;  %s344_s21 = smov [#allocation2]   ;;  %s345_s23 = smov [#allocation5]  }
   0x3   :  { %s22_s22 = sshll.u32 %s344_s21, 4  ;;  %s32_s24 = sshll.u32 %s345_s23, 4  ;;  %s23_s22 = int_to_ptr.vmem [resolvable:$true] %s22_s22  ;;  %s33_s24 = int_to_ptr.vmem [resolvable:$true] %s32_s24 }
   0x4   :  { %s286_s25 = scalar_lea.vmem %s23_s22, 256  ;;  %p291_p1 = scmp.lt.s32.totalorder %s23_s22, %s23_s22 }
   0x5   :  { %p287_p0 = scmp.ne.s32.totalorder %s23_s22, %s286_s25  ;;  %p292_p2 = scmp.lt.s32.totalorder %s286_s25, %s286_s25 }
   0x7   :  { %p293_p3 = por %p292_p2, %p291_p1 }
   0x9   :  { %p294_p4 = pnand %p293_p3, %p287_p0 }
   0xb   :  { %297 = shalt.err (!%p294_p4)
}
   0xc   :  { %25 = dma.hbm_to_vmem [thread:$0]  %s410_s1, 256, %s23_s22, [#allocation3]  }
   0xd   :  { %s306_s28 = scalar_lea.vmem %s33_s24, 128  ;;  %p311_p6 = scmp.lt.s32.totalorder %s33_s24, %s33_s24 }
   0xe   :  { %p307_p5 = scmp.ne.s32.totalorder %s33_s24, %s306_s28  ;;  %p312_p7 = scmp.lt.s32.totalorder %s306_s28, %s306_s28 }
  0x10   :  { %p313_p8 = por %p312_p7, %p311_p6 }
  0x12   :  { %p314_p9 = pnand %p313_p8, %p307_p5 }
  0x14   :  { %317 = shalt.err (!%p314_p9)
}
  0x15   :  { %35 = dma.hbm_to_vmem [thread:$0]  %s411_s2, 128, %s33_s24, [#allocation6]  }
  0x16   :  { %338 = dma.done.wait [#allocation3], 256  }
  0x17   :  { %339 = vsyncadd [#allocation3], 4294967040 }
  0x18   :  { %340 = dma.done.wait [#allocation6], 128  }
  0x19   :  { %341 = vsyncadd [#allocation6], 4294967168  ;;  %v54_v0 = vld [vmem:[#allocation2] sm:$0xff]  ;;  %v55_v1 = vld [vmem:[#allocation2 + $0x8] sm:$0xff]  ;;  %v346_v6 = vmov 0.0   ;;  %vm347_vm0 = vmmov 0  }
  0x1a   :  { %v48_v2 = vld [vmem:[%s409_s0] sm:$0xff]  ;;  %v56_v3 = vadd.f32 %v55_v1, %v54_v0  ;;  %v49_v4 = vld [vmem:[%s409_s0 + $0x8] sm:$0xff]  ;;  %254 = vmatprep.subr.mxu0 %v346_v6  ;;  %261 = vmatprep.subr.mxu1 %v346_v6  ;;  %v60_v11 = vld [vmem:[#allocation5] sm:$0xff]  ;;  %vm62_vm1 = vcmask 130048   ;;  %vm139_vm2 = vcmask 64512   ;;  %v348_v18 = vmov 0  }
  0x1b   :  { %v50_v5 = vadd.f32 %v49_v4, %v48_v2  ;;  %258 = vmatprep.mubr.msk.f32.mxu0 %vm347_vm0, %v346_v6  ;;  %263 = vmatprep.mubr.msk.f32.mxu1 %vm347_vm0, %v346_v6  ;;  %v61_v12 = vld [vmem:[%s412_s3] sm:$0xff]  ;;  %s349_s3 = smov [#allocation7]  }
  0x1c   :  { %57 = vadd.xlane.f32.xlu0 %v56_v3  ;;  %v137_v17 = vld [vmem:[%s413_s4] sm:$0xff]  ;;  %272 = vset.pattern.permute.xlu1 %v348_v18  ;;  %s236_s4 = sshll.u32 %s349_s3, 4  ;;  %s237_s4 = int_to_ptr.vmem [resolvable:$true] %s236_s4 }
  0x1d   :  { %273 = vset.pattern.permute.xlu0 %v348_v18  ;;  %v138_v19 = vld [vmem:[%s414_s5] sm:$0xff]  ;;  %s318_s5 = scalar_lea.vmem %s237_s4, 256  ;;  %p323_p11 = scmp.lt.s32.totalorder %s237_s4, %s237_s4 }
  0x1e   :  { %p319_p10 = scmp.ne.s32.totalorder %s237_s4, %s318_s5  ;;  %p324_p12 = scmp.lt.s32.totalorder %s318_s5, %s318_s5 }
  0x20   :  { %51 = vadd.xlane.f32.xlu0 %v50_v5  ;;  %p325_p13 = por %p324_p12, %p323_p11 }
  0x22   :  { %p326_p0 = pnand %p325_p13, %p319_p10 }
  0xa5   :  { %v58_v7 = vpop.xlane.xlu0 %57 }
  0xa6   :  { %v59_v8 = vmul.f32 0.00390625, %v58_v7 }
  0xa8   :  { %255 = vmatpush3.msra.mxu0 %v59_v8 }
  0xa9   :  { %v52_v9 = vpop.xlane.xlu0 %51  ;;  %256 = vmatprep.subr.mxu0 %v346_v6 }
  0xaa   :  { %v53_v10 = vmul.f32 0.00390625, %v52_v9 }
  0xac   :  { %257 = vmatpush3.msra.mxu0 %v53_v10 }
  0xad   :  { %259 = vmatmul.mubr.msk.f32.vlgmr.msra.gmra.mxu0 %vm62_vm1, %v60_v11 }
 0x16d   :  { %v132_v13 = vpop.f32.mrf.mxu0 }
 0x16e   :  { %v133_v14 = vadd.f32 %v132_v13, %v61_v12 }
 0x16f   :  { %v260_v15 = vpop.f32.mrf.mxu0 }
 0x170   :  { %v136_v16 = vmax.f32 %v133_v14, 0.0 }
 0x172   :  { %262 = vmatpush3.msra.mxu1 %v136_v16 }
 0x173   :  { %264 = vmatmul.mubr.msk.f32.vlgmr.msra.gmra.mxu1 %vm139_vm2, %v137_v17 }
 0x233   :  { %v209_v20 = vpop.f32.mrf.mxu1 }
 0x234   :  { %v210_v21 = vadd.f32 %v209_v20, %v138_v19 }
 0x235   :  { %v265_v22 = vpop.f32.mrf.mxu1 }
 0x236   :  { %v248_v23 = vmul.f32 -1.442695, %v210_v21 }
 0x238   :  { %274 = vpow2.f32 %v248_v23 }
 0x245   :  { %v275_v24 = vpop.eup %274 }
 0x246   :  { %v216_v25 = vadd.f32 1.0, %v275_v24 }
 0x248   :  { %276 = vrcp.f32 %v216_v25 }
 0x255   :  { %v277_v26 = vpop.eup %276 }
 0x256   :  { %221 = vperm.xlu1 %272, %v277_v26  }
 0x2d1   :  { %v222_v27 = vpop.permute.xlu1 %221 }
 0x2d2   :  { %v224_v28 = vmul.f32 %v222_v27, %v54_v0  ;;  %v225_v29 = vmul.f32 %v222_v27, %v55_v1 }
 0x2d4   :  { %v226_v30 = vadd.f32 %v224_v28, %v48_v2  ;;  %v227_v31 = vadd.f32 %v225_v29, %v49_v4 }
 0x2d6   :  { %228 = vst [vmem:[#allocation7] sm:$0xff] %v226_v30  ;;  %229 = vst [vmem:[#allocation7 + $0x8] sm:$0xff] %v227_v31 }
 0x2d7   :  { %329 = shalt.err (!%p326_p0)
}
 0x2d8   :  { %239 = dma.vmem_to_hbm [thread:$0]  %s237_s4, 256, %s415_s6, [#allocation4]  }
 0x2d9   :  { %342 = dma.done.wait [#allocation4], 256  }
 0x2da   :  { %343 = vsyncadd [#allocation4], 4294967040 }
 0x2db   :  { %243 = vsyncpa [#allocation3], 1 }
 0x2dc   :  { %244 = vsyncpa [#allocation6], 1 }
 0x2dd   :  { %245 = vsyncpa [#allocation4], 1 }

</bundles_post_ra>
